<compile_context>
chip_gen: v5e
topology: v5e:2x2
jax: 0.10.0
libtpu: 0.0.40
codegen_flags: <defaults>
</compile_context>

<pallas_src>
import functools
import math

import jax
import jax.numpy as jnp
from jax.experimental import pallas as pl
from jax.experimental.pallas import tpu as pltpu


# ---------------------------------------------------------------------------
# Chip detection (cached): TensorCores per chip + a safe VMEM-limit ceiling.
# ---------------------------------------------------------------------------
@functools.lru_cache(maxsize=None)
def _chip_info():
    kind = ""
    try:
        kind = jax.devices()[0].device_kind.lower()
    except Exception:
        pass
    is_v7 = ("v7" in kind) or ("7x" in kind)
    num_tc = 2 if is_v7 else 1
    # VMEM per TensorCore: 64 MiB on v7x, 128 MiB on v5e/v6e.  Leave headroom.
    cap = (48 << 20) if is_v7 else (100 << 20)
    try:
        cap = min(cap, int(0.75 * pltpu.get_tpu_info().vmem_capacity_bytes))
    except Exception:
        pass
    return num_tc, cap


# ---------------------------------------------------------------------------
# Kernel
# ---------------------------------------------------------------------------
def _gcn_kernel(x_ref, adj_ref, w_ref, b_ref, o_ref):
    # x_ref:   (Bt*N, Fin)  rows of this batch tile, flattened in the wrapper
    # adj_ref: (Bt, N, N)
    # w_ref:   (Fin, Fp)    Fp = Fout padded to a multiple of 128 lanes
    # b_ref:   (1, Fp)      float32
    # o_ref:   (Bt*N, Fp)   float32, lane-dense stores
    Bt, N, _ = adj_ref.shape

    # One MXU issue over all Bt*N rows: support = x @ W - bias (f32 accumulate).
    support = jnp.dot(x_ref[...], w_ref[...], preferred_element_type=jnp.float32)
    support = support - b_ref[...]                       # (Bt*N, Fp)

    # Per-sample adjacency matmul on 2-D, sublane-aligned slices (no 3-D
    # reshape / relayout).  Bt <= 2, so this static loop is tiny.
    for b in range(Bt):
        sup_b = support[b * N:(b + 1) * N, :]            # (N, Fp)
        acc = jnp.dot(adj_ref[b], sup_b, preferred_element_type=jnp.float32)
        o_ref[pl.ds(b * N, N), :] = jnp.maximum(acc, 0.0)


# ---------------------------------------------------------------------------
# Parameter prep (hoisted out of the per-forward path)
# ---------------------------------------------------------------------------
def prepare_params(weight, bias, matmul_dtype=jnp.float32):
    """Pad W / bias once to a lane-dense feature width (multiple of 128)."""
    Fin, Fout = weight.shape
    Fp = ((Fout + 127) // 128) * 128
    w_pad = jnp.pad(weight.astype(matmul_dtype), ((0, 0), (0, Fp - Fout)))
    b_pad = jnp.pad(bias.reshape(1, Fout).astype(jnp.float32),
                    ((0, 0), (0, Fp - Fout)))
    return w_pad, b_pad


def init_params(key, in_features, out_features):
    """Matches the PyTorch module: xavier_uniform_(gain=1.414), bias zeros."""
    gain = 1.414
    bound = gain * math.sqrt(6.0 / (in_features + out_features))
    weight = jax.random.uniform(
        key, (in_features, out_features), dtype=jnp.float32,
        minval=-bound, maxval=bound,
    )
    bias = jnp.zeros((1, 1, out_features), dtype=jnp.float32)
    return weight, bias


# ---------------------------------------------------------------------------
# Forward
# ---------------------------------------------------------------------------
def graph_convolution(x, adj, w_pad, b_pad, *, out_features=None,
                      trim_output=True):
    """Pallas TPU implementation of GraphConvolution.forward.

    w_pad / b_pad must come from prepare_params() (padding hoisted out of the
    hot path).  If trim_output is False the padded (B, N, Fp) activation is
    returned so a downstream consumer can fuse/alias it.
    """
    B, N, Fin = x.shape
    Fp = w_pad.shape[1]
    assert adj.shape == (B, N, N)
    assert w_pad.shape[0] == Fin
    assert b_pad.shape == (1, Fp)

    num_tc, vmem_cap = _chip_info()

    # Batch tiling: split only when a second TensorCore exists (v7x) and the
    # split keeps blocks sublane-aligned; otherwise one full-batch step.
    num_steps = 1
    if num_tc > 1 and B >= 2 and B % 2 == 0 and ((B // 2) * N) % 8 == 0:
        num_steps = 2
    Bt = B // num_steps

    matmul_dtype = w_pad.dtype
    x2d = x.reshape(B * N, Fin).astype(matmul_dtype)   # free reshape; nop cast in f32
    adj_c = adj.astype(matmul_dtype)

    # Advisory cost estimate so XLA can schedule around this tiny call.
    flops = 2 * B * N * Fin * Fp + 2 * B * N * N * Fp
    isz = jnp.dtype(matmul_dtype).itemsize
    bytes_accessed = (isz * (B * N * Fin + B * N * N + Fin * Fp)
                      + 4 * (Fp + B * N * Fp))
    cost = pl.CostEstimate(flops=flops, transcendentals=0,
                           bytes_accessed=bytes_accessed)

    # VMEM budget: double-buffered tiles + weights/bias + 1 MiB headroom,
    # clamped to a generation-aware ceiling (no artificial 32 MiB floor).
    in_tile = isz * (Bt * N * Fin + Bt * N * N + Fin * Fp) + 4 * Fp
    out_tile = 4 * Bt * N * Fp
    vmem_need = 2 * (in_tile + out_tile) + (1 << 20)
    vmem_limit = int(min(max(vmem_need, 4 << 20), vmem_cap))

    # NOTE: W / bias are grid-invariant; with realistic Fin on v7x they should
    # be single-buffered (pipeline_mode) to save VMEM — irrelevant at Fin=16.
    out2d = pl.pallas_call(
        _gcn_kernel,
        out_shape=jax.ShapeDtypeStruct((B * N, Fp), jnp.float32),
        grid_spec=pltpu.PrefetchScalarGridSpec(
            num_scalar_prefetch=0,
            grid=(num_steps,),
            in_specs=[
                pl.BlockSpec((Bt * N, Fin), lambda b: (b, 0)),
                pl.BlockSpec((Bt, N, N), lambda b: (b, 0, 0)),
                pl.BlockSpec((Fin, Fp), lambda b: (0, 0)),
                pl.BlockSpec((1, Fp), lambda b: (0, 0)),
            ],
            out_specs=pl.BlockSpec((Bt * N, Fp), lambda b: (b, 0)),
        ),
        compiler_params=pltpu.CompilerParams(
            dimension_semantics=("parallel",),
            vmem_limit_bytes=vmem_limit,
        ),
        cost_estimate=cost,
    )(x2d, adj_c, w_pad, b_pad)

    out = out2d.reshape(B, N, Fp)                       # free (contiguous) reshape
    if trim_output and out_features is not None and out_features != Fp:
        # Padded columns are exactly zero, so the slice is exact.  Callers that
        # chain layers should pass trim_output=False and consume the padded slab.
        out = out[..., :out_features]
    return out


def _reference(x, adj, weight, bias):
    support = jnp.einsum("bnf,fo->bno", x, weight) - bias
    return jax.nn.relu(jnp.einsum("bnm,bmo->bno", adj, support))


if __name__ == "__main__":
    B, N, Fin, Fout = 2, 16, 16, 32

    key = jax.random.PRNGKey(0)
    kx, ka, kw = jax.random.split(key, 3)

    x = jax.random.normal(kx, (B, N, Fin), dtype=jnp.float32)
    # A symmetric, row-normalized adjacency (dense, per-sample).
    a_raw = jax.random.uniform(ka, (B, N, N), dtype=jnp.float32)
    adj = (a_raw + jnp.swapaxes(a_raw, 1, 2)) * 0.5
    adj = adj / jnp.sum(adj, axis=-1, keepdims=True)

    weight, bias = init_params(kw, Fin, Fout)
    # Hoisted once (not per forward): lane-dense padded parameters.
    w_pad, b_pad = prepare_params(weight, bias)

    out = graph_convolution(x, adj, w_pad, b_pad, out_features=Fout)
    out = jax.block_until_ready(out)

    ref = _reference(x, adj, weight, bias)
    assert out.shape == (B, N, Fout)
    assert jnp.allclose(out, ref, atol=1e-3, rtol=1e-3), "mismatch vs reference"

    print("KERNEL_OK")
</pallas_src>

<mosaic_0001>
module attributes {stable_mosaic.version = 11 : i64} {
  func.func @_gcn_kernel(%arg0: i32, %arg1: memref<32x16xf32, #tpu.memory_space<vmem>>, %arg2: memref<2x16x16xf32, #tpu.memory_space<vmem>>, %arg3: memref<16x128xf32, #tpu.memory_space<vmem>>, %arg4: memref<1x128xf32, #tpu.memory_space<vmem>>, %arg5: memref<32x128xf32, #tpu.memory_space<vmem>>) attributes {dimension_semantics = [#tpu.dimension_semantics<parallel>], iteration_bounds = array<i64: 1>, scalar_prefetch = 0 : i64, scratch_operands = 0 : i64, tpu.core_type = #tpu.core_type<tc>, window_params = [{transform_indices = @transform_0, window_bounds = array<i64: 32, 16>}, {transform_indices = @transform_1, window_bounds = array<i64: 2, 16, 16>}, {pipeline_mode = #tpu.pipeline_mode<synchronous>, transform_indices = @transform_2, window_bounds = array<i64: 16, 128>}, {pipeline_mode = #tpu.pipeline_mode<synchronous>, transform_indices = @transform_3, window_bounds = array<i64: 1, 128>}, {transform_indices = @transform_4, window_bounds = array<i64: 32, 128>}]} {
    %c0 = arith.constant 0 : index
    %c0_0 = arith.constant 0 : index
    %0 = vector.load %arg1[%c0, %c0_0] : memref<32x16xf32, #tpu.memory_space<vmem>>, vector<32x16xf32>
    %c0_1 = arith.constant 0 : index
    %c0_2 = arith.constant 0 : index
    %1 = vector.load %arg3[%c0_1, %c0_2] : memref<16x128xf32, #tpu.memory_space<vmem>>, vector<16x128xf32>
    %cst = arith.constant dense<0.000000e+00> : vector<32x128xf32>
    %2 = tpu.matmul %0, %1, %cst {dimension_numbers = #tpu.dot_dimension_numbers<[1], [0], [0], [1], [0, 0, 1, 1], [], []>} : vector<32x16xf32>, vector<16x128xf32>, vector<32x128xf32> -> vector<32x128xf32>
    %c0_3 = arith.constant 0 : index
    %c0_4 = arith.constant 0 : index
    %3 = vector.load %arg4[%c0_3, %c0_4] : memref<1x128xf32, #tpu.memory_space<vmem>>, vector<1x128xf32>
    %4 = vector.broadcast %3 : vector<1x128xf32> to vector<32x128xf32>
    %5 = arith.subf %2, %4 : vector<32x128xf32>
    %6 = vector.extract_strided_slice %5 {offsets = [0, 0], sizes = [16, 128], strides = [1, 1]} : vector<32x128xf32> to vector<16x128xf32>
    %c0_5 = arith.constant 0 : index
    %c0_6 = arith.constant 0 : index
    %c0_7 = arith.constant 0 : index
    %7 = vector.load %arg2[%c0_5, %c0_6, %c0_7] : memref<2x16x16xf32, #tpu.memory_space<vmem>>, vector<1x16x16xf32>
    %8 = vector.shape_cast %7 : vector<1x16x16xf32> to vector<16x16xf32>
    %cst_8 = arith.constant dense<0.000000e+00> : vector<16x128xf32>
    %9 = tpu.matmul %8, %6, %cst_8 {dimension_numbers = #tpu.dot_dimension_numbers<[1], [0], [0], [1], [0, 0, 1, 1], [], []>} : vector<16x16xf32>, vector<16x128xf32>, vector<16x128xf32> -> vector<16x128xf32>
    %cst_9 = arith.constant 0.000000e+00 : f32
    %10 = vector.broadcast %cst_9 : f32 to vector<16x128xf32>
    %11 = arith.maximumf %9, %10 : vector<16x128xf32>
    %c0_10 = arith.constant 0 : index
    %c0_11 = arith.constant 0 : index
    %12 = vector.load %arg5[%c0_10, %c0_11] : memref<32x128xf32, #tpu.memory_space<vmem>>, vector<16x128xf32>
    tpu.vector_store %arg5[%c0_10, %c0_11], %11 {strides = array<i32>} : memref<32x128xf32, #tpu.memory_space<vmem>>, vector<16x128xf32>,
    %13 = vector.extract_strided_slice %5 {offsets = [16, 0], sizes = [16, 128], strides = [1, 1]} : vector<32x128xf32> to vector<16x128xf32>
    %c1 = arith.constant 1 : index
    %c0_12 = arith.constant 0 : index
    %c0_13 = arith.constant 0 : index
    %14 = vector.load %arg2[%c1, %c0_12, %c0_13] : memref<2x16x16xf32, #tpu.memory_space<vmem>>, vector<1x16x16xf32>
    %15 = vector.shape_cast %14 : vector<1x16x16xf32> to vector<16x16xf32>
    %cst_14 = arith.constant dense<0.000000e+00> : vector<16x128xf32>
    %16 = tpu.matmul %15, %13, %cst_14 {dimension_numbers = #tpu.dot_dimension_numbers<[1], [0], [0], [1], [0, 0, 1, 1], [], []>} : vector<16x16xf32>, vector<16x128xf32>, vector<16x128xf32> -> vector<16x128xf32>
    %cst_15 = arith.constant 0.000000e+00 : f32
    %17 = vector.broadcast %cst_15 : f32 to vector<16x128xf32>
    %18 = arith.maximumf %16, %17 : vector<16x128xf32>
    %c16 = arith.constant 16 : index
    %c0_16 = arith.constant 0 : index
    %19 = vector.load %arg5[%c16, %c0_16] : memref<32x128xf32, #tpu.memory_space<vmem>>, vector<16x128xf32>
    tpu.vector_store %arg5[%c16, %c0_16], %18 {strides = array<i32>} : memref<32x128xf32, #tpu.memory_space<vmem>>, vector<16x128xf32>,
    return
  }
  func.func @transform_0(%arg0: i32) -> (i32, i32) {
    %c0_i32 = arith.constant 0 : i32
    %c0_i32_0 = arith.constant 0 : i32
    return %arg0, %c0_i32 : i32, i32
  }
  func.func @transform_1(%arg0: i32) -> (i32, i32, i32) {
    %c0_i32 = arith.constant 0 : i32
    %c0_i32_0 = arith.constant 0 : i32
    %c0_i32_1 = arith.constant 0 : i32
    return %arg0, %c0_i32, %c0_i32_0 : i32, i32, i32
  }
  func.func @transform_2(%arg0: i32) -> (i32, i32) {
    %c0_i32 = arith.constant 0 : i32
    %c0_i32_0 = arith.constant 0 : i32
    %c0_i32_1 = arith.constant 0 : i32
    return %c0_i32, %c0_i32_0 : i32, i32
  }
  func.func @transform_3(%arg0: i32) -> (i32, i32) {
    %c0_i32 = arith.constant 0 : i32
    %c0_i32_0 = arith.constant 0 : i32
    %c0_i32_1 = arith.constant 0 : i32
    return %c0_i32, %c0_i32_0 : i32, i32
  }
  func.func @transform_4(%arg0: i32) -> (i32, i32) {
    %c0_i32 = arith.constant 0 : i32
    %c0_i32_0 = arith.constant 0 : i32
    return %arg0, %c0_i32 : i32, i32
  }
}

</mosaic_0001>

<bundles_post_ra>
// kernel: tpu_custom_call.1
= control target key start
LH: loop header
LB: loop body
LE: loop exit
PB: predicated region body
PF: predicated region fallthrough
CT: control target
= control target key end

     0   :  { %vm24_vm0 = vcmask 130048   ;;  %s277_s0 = inlined_call_operand.vmem [shape: f32[32,16], index: 0, kind: input, shape index: {}]   ;;  %s278_s1 = inlined_call_operand.vmem [shape: f32[2,16,16], index: 1, kind: input, shape index: {}]   ;;  %s279_s2 = inlined_call_operand.vmem [shape: f32[16,128], index: 2, kind: input, shape index: {}]   ;;  %s280_s3 = inlined_call_operand.vmem [shape: f32[1,128], index: 3, kind: input, shape index: {}]   ;;  %s281_s4 = inlined_call_operand.hbm [shape: f32[32,128], index: 4, kind: output, shape index: {}]  }
   0x1   :  { %v23_v0 = vld [vmem:[%s279_s2 + $0x8] sm:$0xff]  ;;  %v22_v1 = vld [vmem:[%s279_s2] sm:$0xff]  ;;  %v20_v2 = vld [vmem:[%s277_s0 + $0x10] sm:$0xff] }
   0x2   :  { %173 = vmatpush.msra.mxu3 %v23_v0  ;;  %51 = vmatpush.msra.mxu0 %v23_v0  ;;  %v18_v3 = vld [vmem:[%s277_s0] sm:$0xff] }
   0x3   :  { %9 = vsyncpa [#allocation3], 0  ;;  %v21_v4 = vld [vmem:[%s277_s0 + $0x18] sm:$0xff]  ;;  %v19_v5 = vld [vmem:[%s277_s0 + $0x8] sm:$0xff]  ;;  %s205_s8 = smov [#allocation2]   ;;  %s151_s12 = sshll.u32 %s281_s4, 4  ;;  %s152_s12 = int_to_ptr.hbm [resolvable:$true] %s151_s12 }
   0x4   :  { %174 = vmatpush.msra.mxu3 %v22_v1  ;;  %52 = vmatpush.msra.mxu0 %v22_v1  ;;  %v178_v8 = vld [vmem:[%s280_s3] ss:$0 sm:$0xff]  ;;  %v169_v16 = vld [vmem:[%s278_s1 + $0x10] sm:$0xff]  ;;  %v75_v17 = vld [vmem:[%s278_s1 + $0x8] sm:$0xff]  ;;  %s149_s9 = sshll.u32 %s205_s8, 4  ;;  %s207_s13 = smov 8   ;;  %s150_s9 = int_to_ptr.vmem [resolvable:$true] %s149_s9 }
   0x5   :  { %165 = vmatmul.msk.f32.vlgmr.msra.gmra.mxu3 %vm24_vm0, %v20_v2  ;;  %163 = vmatmul.msk.f32.vlgmr.msra.gmra.mxu0 %vm24_vm0, %v18_v3  ;;  %v74_v12 = vld [vmem:[%s278_s1] sm:$0xff]  ;;  %v170_v18 = vld [vmem:[%s278_s1 + $0x18] sm:$0xff]  ;;  %s206_s1 = smov 128  }
   0xd   :  { %166 = vmatmul.msk.f32.gmra.mxu3 %vm24_vm0, %v21_v4  ;;  %164 = vmatmul.msk.f32.gmra.mxu0 %vm24_vm0, %v19_v5 }
  0x82   :  { %v54_v6 = vpop.f32.mrf.mxu0 }
  0x83   :  { %v70_v10 = vsub.f32 %v54_v6, %v178_v8 }
  0x88   :  { %v60_v7 = vpop.f32.mrf.mxu3 }
  0x89   :  { %v72_v15 = vsub.f32 %v60_v7, %v178_v8 }
  0x8a   :  { %v57_v9 = vpop.f32.mrf.mxu0 }
  0x8b   :  { %v71_v11 = vsub.f32 %v57_v9, %v178_v8 }
  0x8d   :  { %96 = vmatpush.msra.mxu1 %v71_v11 }
  0x8f   :  { %97 = vmatpush.msra.mxu1 %v70_v10 }
  0x90   :  { %v63_v13 = vpop.f32.mrf.mxu3  ;;  %167 = vmatmul.msk.f32.vlgmr.msra.gmra.mxu1 %vm24_vm0, %v74_v12 }
  0x91   :  { %v73_v14 = vsub.f32 %v63_v13, %v178_v8 }
  0x93   :  { %132 = vmatpush.msra.mxu2 %v73_v14 }
  0x95   :  { %133 = vmatpush.msra.mxu2 %v72_v15 }
  0x96   :  { %171 = vmatmul.msk.f32.vlgmr.msra.gmra.mxu2 %vm24_vm0, %v169_v16 }
  0x98   :  { %168 = vmatmul.msk.f32.gmra.mxu1 %vm24_vm0, %v75_v17 }
  0x9e   :  { %172 = vmatmul.msk.f32.gmra.mxu2 %vm24_vm0, %v170_v18 }
 0x10d   :  { %v99_v19 = vpop.f32.mrf.mxu1 }
 0x10e   :  { %v105_v20 = vmax.f32 %v99_v19, 0.0 }
 0x110   :  { %107 = vst [vmem:[#allocation2] sm:$0xff] %v105_v20 }
 0x115   :  { %v102_v21 = vpop.f32.mrf.mxu1 }
 0x116   :  { %v106_v22 = vmax.f32 %v102_v21, 0.0 }
 0x118   :  { %108 = vst [vmem:[#allocation2 + $0x8] sm:$0xff] %v106_v22 }
 0x119   :  { %v135_v23 = vpop.f32.mrf.mxu2 }
 0x11a   :  { %v141_v24 = vmax.f32 %v135_v23, 0.0 }
 0x11c   :  { %143 = vst [vmem:[#allocation2 + $0x10] sm:$0xff] %v141_v24 }
 0x121   :  { %v138_v25 = vpop.f32.mrf.mxu2 }
 0x122   :  { %v142_v26 = vmax.f32 %v138_v25, 0.0 }
 0x124   :  { %144 = vst [vmem:[#allocation2 + $0x18] sm:$0xff] %v142_v26 }
 0x125   :  { %157 = dma.vmem_to_hbm [thread:$0]  %s150_s9, 512, %s152_s12, [#allocation3], %s206_s1, %s206_s1, %s207_s13  }
 0x126   :  { %203 = dma.done.wait [#allocation3], 512  }
 0x127   :  { %204 = vsyncadd [#allocation3], 4294966784 }
 0x128   :  { %162 = vsyncpa [#allocation3], 1 }

</bundles_post_ra>
